<compile_context>
chip_gen: v5e
topology: v5e:2x2
jax: 0.10.0
libtpu: 0.0.40
codegen_flags: <defaults>
</compile_context>

<pallas_src>
import jax
import jax.numpy as jnp
from jax.experimental import pallas as pl
from jax.experimental.pallas import tpu as pltpu

EPS = 1e-5                       # torch.nn.BatchNorm1d default
D_IN, D_H, D_OUT = 310, 128, 64
K_PAD, N_PAD = 384, 128          # lane-aligned paddings (310->384, 64->128)


def _round_up(a, b):
    return (a + b - 1) // b * b


def _make_kernel(*, tb, batch, padded, use_cache):
    """Fused kernel for a batch tile of `tb` rows (real batch = `batch`)."""
    inv_n = 1.0 / float(batch)

    def kernel(x_ref, w1_ref, w2_ref, bn_ref, o_ref, stats_ref, norm_ref, *caches):
        if use_cache:
            h_cache, z_cache = caches
        p = pl.program_id(0)      # phase: 0 = BN1 stats, 1 = BN2 stats, 2 = write out
        i = pl.program_id(1)      # batch tile
        nb = pl.num_programs(1)

        def h_from_x():
            # Linear(310->128): bf16 operands, f32 accumulation on the MXU.
            return jnp.dot(x_ref[...], w1_ref[...],
                           preferred_element_type=jnp.float32)

        def bn1_relu(h):
            return jnp.maximum(h * norm_ref[0:1, :] + norm_ref[1:2, :], 0.0)

        def z_from_a(a):
            # Linear(128->64), output padded to 128 lanes (zero W2 columns).
            return jnp.dot(a.astype(jnp.bfloat16), w2_ref[...],
                           preferred_element_type=jnp.float32)

        # -------- phase 0: full-batch stats of h (padded rows are exact zeros) -----
        @pl.when(p == 0)
        def _phase0():
            @pl.when(i == 0)
            def _():
                stats_ref[...] = jnp.zeros_like(stats_ref)

            h = h_from_x()
            if use_cache:
                h_cache[i] = h.astype(jnp.bfloat16)
            upd = jnp.concatenate([jnp.sum(h, axis=0, keepdims=True),
                                   jnp.sum(h * h, axis=0, keepdims=True)], axis=0)
            stats_ref[0:2, :] = stats_ref[0:2, :] + upd

            @pl.when(i == nb - 1)
            def _():
                mean1 = stats_ref[0:1, :] * inv_n
                var1 = jnp.maximum(stats_ref[1:2, :] * inv_n - mean1 * mean1, 0.0)
                scale1 = bn_ref[0:1, :] * jax.lax.rsqrt(var1 + EPS)
                shift1 = bn_ref[1:2, :] - mean1 * scale1
                norm_ref[0:2, :] = jnp.concatenate([scale1, shift1], axis=0)

        # -------- phase 1: BN1 + ReLU, z = a@W2, full-batch stats of z -------------
        @pl.when(p == 1)
        def _phase1():
            h = h_cache[i].astype(jnp.float32) if use_cache else h_from_x()
            z = z_from_a(bn1_relu(h))
            if use_cache:
                z_cache[i] = z.astype(jnp.bfloat16)

            if padded:
                # Padded rows have h == 0 but ReLU(shift1) may be non-zero, so z of
                # padded rows must not contribute to the batch statistics.
                row = jax.lax.broadcasted_iota(jnp.int32, (tb, 1), 0)
                valid = ((i * tb + row) < batch).astype(jnp.float32)
                zm = z * valid
            else:
                zm = z
            upd = jnp.concatenate([jnp.sum(zm, axis=0, keepdims=True),
                                   jnp.sum(zm * z, axis=0, keepdims=True)], axis=0)
            stats_ref[2:4, :] = stats_ref[2:4, :] + upd

            @pl.when(i == nb - 1)
            def _():
                mean2 = stats_ref[2:3, :] * inv_n
                var2 = jnp.maximum(stats_ref[3:4, :] * inv_n - mean2 * mean2, 0.0)
                scale2 = bn_ref[2:3, :] * jax.lax.rsqrt(var2 + EPS)
                shift2 = bn_ref[3:4, :] - mean2 * scale2
                norm_ref[2:4, :] = jnp.concatenate([scale2, shift2], axis=0)

        # -------- phase 2: BN2 + ReLU, write the (tb, 64) output tile --------------
        @pl.when(p == 2)
        def _phase2():
            if use_cache:
                z = z_cache[i].astype(jnp.float32)
            else:
                z = z_from_a(bn1_relu(h_from_x()))
            y = jnp.maximum(z * norm_ref[2:3, :] + norm_ref[3:4, :], 0.0)
            # Padded columns 64..127 are exact zeros (gamma2 padding = 0); only the
            # real 64 lanes are stored to HBM.
            o_ref[...] = y[:, :D_OUT]

    return kernel


def seedbase_forward(x, packed_params, *, block_rows=1024):
    """x: any array whose leading dim is batch and which flattens to (B, 310)."""
    w1p, w2p, bnp = packed_params
    B = x.shape[0]

    # x.reshape(B, 310).float(), then bf16 for the MXU operands.
    x2 = x.reshape(B, D_IN).astype(jnp.float32).astype(jnp.bfloat16)

    tb = min(_round_up(block_rows, 16), _round_up(B, 16))   # bf16-packed batch tile
    b_pad = _round_up(B, tb)
    nb = b_pad // tb
    x_pad = jnp.pad(x2, ((0, b_pad - B), (0, K_PAD - D_IN)))

    # ---- per-generation VMEM budget & h/z cache decision ------------------------
    try:
        vmem_cap = int(getattr(pltpu.get_tpu_info(), "vmem_capacity_bytes", 0))
    except Exception:
        vmem_cap = 0
    if vmem_cap <= 0:
        vmem_cap = 64 << 20                       # conservative: v7x physical VMEM
    vmem_limit = min(vmem_cap * 3 // 4, 100 << 20)  # ~48 MiB v7x, ~96 MiB v5e/v6e

    cache_bytes = 2 * b_pad * D_H * 2                         # h_cache + z_cache (bf16)
    fixed_bytes = (2 * tb * K_PAD * 2 + 2 * tb * D_OUT * 4    # double-buffered x / out
                   + K_PAD * D_H * 2 + D_H * N_PAD * 2        # W1 / W2
                   + 4 * 8 * D_H * 4)                         # bn input + stats/norm
    use_cache = cache_bytes + fixed_bytes <= vmem_limit - (4 << 20)

    kernel = _make_kernel(tb=tb, batch=B, padded=(b_pad != B), use_cache=use_cache)

    if use_cache:
        # Read each x tile exactly once (phase 0); park on the last block afterwards
        # so no further x DMAs are issued.
        x_map = lambda p, i: (jnp.where(p == 0, i, nb - 1), 0)
    else:
        x_map = lambda p, i: (i, 0)               # fallback: re-read + recompute

    scratch = [pltpu.VMEM((8, D_H), jnp.float32),   # rows 0-3: sum_h, sumsq_h, sum_z, sumsq_z
               pltpu.VMEM((8, D_H), jnp.float32)]   # rows 0-3: scale1, shift1, scale2, shift2
    if use_cache:
        scratch += [pltpu.VMEM((nb, tb, D_H), jnp.bfloat16),   # h cache
                    pltpu.VMEM((nb, tb, D_H), jnp.bfloat16)]   # z cache (128-lane padded)

    mm1 = 2 * b_pad * K_PAD * D_H
    mm2 = 2 * b_pad * D_H * N_PAD
    flops = (mm1 + mm2) if use_cache else (3 * mm1 + 2 * mm2)
    x_reads = 1 if use_cache else 3
    bytes_accessed = (x_reads * b_pad * K_PAD * 2 + K_PAD * D_H * 2 + D_H * N_PAD * 2
                      + 8 * D_H * 4 + b_pad * D_OUT * 4)

    out = pl.pallas_call(
        kernel,
        out_shape=jax.ShapeDtypeStruct((b_pad, D_OUT), jnp.float32),
        grid=(3, nb),
        in_specs=[
            pl.BlockSpec((tb, K_PAD), x_map),                   # x tile
            pl.BlockSpec((K_PAD, D_H), lambda p, i: (0, 0)),    # W1 (DMA'd once)
            pl.BlockSpec((D_H, N_PAD), lambda p, i: (0, 0)),    # W2 (DMA'd once)
            pl.BlockSpec((8, D_H), lambda p, i: (0, 0)),        # packed BN gamma/beta
        ],
        # Output tiles only exist in phase 2; earlier phases park on block 0, which
        # is fully overwritten in phase 2 before its first (and only) write-back.
        out_specs=pl.BlockSpec((tb, D_OUT),
                               lambda p, i: (jnp.where(p == 2, i, 0), 0)),
        scratch_shapes=scratch,
        compiler_params=pltpu.CompilerParams(
            # Phases are ordered and the batch axis carries the full-batch BN
            # statistics accumulator, so both axes must stay sequential.
            dimension_semantics=("arbitrary", "arbitrary"),
            vmem_limit_bytes=int(vmem_limit),
        ),
        cost_estimate=pl.CostEstimate(
            flops=flops, transcendentals=2 * D_H, bytes_accessed=bytes_accessed),
    )(x_pad, w1p, w2p, bnp)

    return out[:B, :]


def init_params(key):
    """PyTorch-style init (uniform(-1/sqrt(fan_in), 1/sqrt(fan_in)); BN gamma=1, beta=0).
    Linear biases are intentionally absent: under training-mode BatchNorm they are
    exactly cancelled by the batch-mean subtraction."""
    k1, k2 = jax.random.split(key)
    lim1 = 1.0 / (D_IN ** 0.5)
    lim2 = 1.0 / (D_H ** 0.5)
    w1 = jax.random.uniform(k1, (D_IN, D_H), jnp.float32, -lim1, lim1)   # torch weight.T
    w2 = jax.random.uniform(k2, (D_H, D_OUT), jnp.float32, -lim2, lim2)  # torch weight.T
    g1 = jnp.ones((D_H,), jnp.float32)
    be1 = jnp.zeros((D_H,), jnp.float32)
    g2 = jnp.ones((D_OUT,), jnp.float32)
    be2 = jnp.zeros((D_OUT,), jnp.float32)
    return w1, g1, be1, w2, g2, be2


def pack_params(w1, g1, be1, w2, g2, be2):
    """One-time (offline) padding / packing into kernel-friendly form.
    Invariant: padded W2 columns and padded gamma2/beta2 entries MUST be zero
    (keeps the padded z lanes structurally zero inside the kernel)."""
    w1p = jnp.zeros((K_PAD, D_H), jnp.float32).at[:D_IN, :].set(w1).astype(jnp.bfloat16)
    w2p = jnp.zeros((D_H, N_PAD), jnp.float32).at[:, :D_OUT].set(w2).astype(jnp.bfloat16)
    bnp = (jnp.zeros((8, D_H), jnp.float32)
           .at[0, :].set(g1).at[1, :].set(be1)
           .at[2, :D_OUT].set(g2).at[3, :D_OUT].set(be2))
    return w1p, w2p, bnp


def seedbase_reference(x, raw_params):
    """Pure-JAX reference with the same bf16-operand / f32-accum convention."""
    w1, g1, be1, w2, g2, be2 = raw_params
    B = x.shape[0]
    xf = x.reshape(B, D_IN).astype(jnp.float32)
    h = jnp.dot(xf.astype(jnp.bfloat16), w1.astype(jnp.bfloat16),
                preferred_element_type=jnp.float32)
    m1 = jnp.mean(h, axis=0)
    v1 = jnp.mean((h - m1) ** 2, axis=0)
    h = jnp.maximum((h - m1) * jax.lax.rsqrt(v1 + EPS) * g1 + be1, 0.0)
    z = jnp.dot(h.astype(jnp.bfloat16), w2.astype(jnp.bfloat16),
                preferred_element_type=jnp.float32)
    m2 = jnp.mean(z, axis=0)
    v2 = jnp.mean((z - m2) ** 2, axis=0)
    return jnp.maximum((z - m2) * jax.lax.rsqrt(v2 + EPS) * g2 + be2, 0.0)


if __name__ == "__main__":
    key = jax.random.PRNGKey(0)
    kx, kp = jax.random.split(key)

    B = 8                                                  # >1 required by train-mode BN
    x = jax.random.normal(kx, (B, 62, 5), jnp.float32)     # SEED: 62 ch x 5 bands = 310

    raw = init_params(kp)
    packed = pack_params(*raw)

    out = jax.block_until_ready(seedbase_forward(x, packed))
    assert out.shape == (B, D_OUT) and out.dtype == jnp.float32

    ref = seedbase_reference(x, raw)
    err = float(jnp.max(jnp.abs(out - ref)))
    assert jnp.allclose(out, ref, atol=5e-2, rtol=5e-2), err
    print("KERNEL_OK")
</pallas_src>

<mosaic_0001>
module attributes {stable_mosaic.version = 11 : i64} {
  func.func @kernel(%arg0: i32, %arg1: i32, %arg2: memref<16x384xbf16, #tpu.memory_space<vmem>>, %arg3: memref<384x128xbf16, #tpu.memory_space<vmem>>, %arg4: memref<128x128xbf16, #tpu.memory_space<vmem>>, %arg5: memref<8x128xf32, #tpu.memory_space<vmem>>, %arg6: memref<16x64xf32, #tpu.memory_space<vmem>>, %arg7: memref<8x128xf32, #tpu.memory_space<vmem>>, %arg8: memref<8x128xf32, #tpu.memory_space<vmem>>, %arg9: memref<1x16x128xbf16, #tpu.memory_space<vmem>>, %arg10: memref<1x16x128xbf16, #tpu.memory_space<vmem>>) attributes {dimension_semantics = [#tpu.dimension_semantics<arbitrary>, #tpu.dimension_semantics<arbitrary>], iteration_bounds = array<i64: 3, 1>, scalar_prefetch = 0 : i64, scratch_operands = 4 : i64, tpu.core_type = #tpu.core_type<tc>, window_params = [{transform_indices = @transform_0, window_bounds = array<i64: 16, 384>}, {pipeline_mode = #tpu.pipeline_mode<synchronous>, transform_indices = @transform_1, window_bounds = array<i64: 384, 128>}, {pipeline_mode = #tpu.pipeline_mode<synchronous>, transform_indices = @transform_2, window_bounds = array<i64: 128, 128>}, {pipeline_mode = #tpu.pipeline_mode<synchronous>, transform_indices = @transform_3, window_bounds = array<i64: 8, 128>}, {transform_indices = @transform_4, window_bounds = array<i64: 16, 64>}]} {
    %c0_i32 = arith.constant 0 : i32
    %0 = arith.cmpi eq, %arg0, %c0_i32 : i32
    %1 = arith.extui %0 : i1 to i32
    %c0_i32_0 = arith.constant 0 : i32
    %2 = arith.cmpi ne, %1, %c0_i32_0 : i32
    scf.if %2 {
      %c0_i32_3 = arith.constant 0 : i32
      %9 = arith.cmpi eq, %arg1, %c0_i32_3 : i32
      %10 = arith.extui %9 : i1 to i32
      %c0_i32_4 = arith.constant 0 : i32
      %11 = arith.cmpi ne, %10, %c0_i32_4 : i32
      scf.if %11 {
        %cst_18 = arith.constant 0.000000e+00 : f32
        %32 = vector.broadcast %cst_18 : f32 to vector<8x128xf32>
        %c0_19 = arith.constant 0 : index
        %c0_20 = arith.constant 0 : index
        %33 = vector.load %arg7[%c0_19, %c0_20] : memref<8x128xf32, #tpu.memory_space<vmem>>, vector<8x128xf32>
        tpu.vector_store %arg7[%c0_19, %c0_20], %32 {strides = array<i32>} : memref<8x128xf32, #tpu.memory_space<vmem>>, vector<8x128xf32>,
      } else {
      }
      %c0 = arith.constant 0 : index
      %c0_5 = arith.constant 0 : index
      %12 = vector.load %arg2[%c0, %c0_5] : memref<16x384xbf16, #tpu.memory_space<vmem>>, vector<16x384xbf16>
      %c0_6 = arith.constant 0 : index
      %c0_7 = arith.constant 0 : index
      %13 = vector.load %arg3[%c0_6, %c0_7] : memref<384x128xbf16, #tpu.memory_space<vmem>>, vector<384x128xbf16>
      %cst = arith.constant dense<0.000000e+00> : vector<16x128xf32>
      %14 = tpu.matmul %12, %13, %cst {dimension_numbers = #tpu.dot_dimension_numbers<[1], [0], [0], [1], [0, 0, 1, 1], [], []>} : vector<16x384xbf16>, vector<384x128xbf16>, vector<16x128xf32> -> vector<16x128xf32>
      %15 = arith.truncf %14 : vector<16x128xf32> to vector<16x128xbf16>
      %16 = arith.index_cast %arg1 : i32 to index
      %c0_8 = arith.constant 0 : index
      %c0_9 = arith.constant 0 : index
      %17 = vector.load %arg9[%16, %c0_8, %c0_9] : memref<1x16x128xbf16, #tpu.memory_space<vmem>>, vector<1x16x128xbf16>
      %18 = vector.shape_cast %17 : vector<1x16x128xbf16> to vector<16x128xbf16>
      %19 = vector.shape_cast %15 : vector<16x128xbf16> to vector<1x16x128xbf16>
      tpu.vector_store %arg9[%16, %c0_8, %c0_9], %19 {strides = array<i32>} : memref<1x16x128xbf16, #tpu.memory_space<vmem>>, vector<1x16x128xbf16>,
      %cst_10 = arith.constant dense<0.000000e+00> : vector<128xf32>
      %20 = vector.multi_reduction <add>, %14, %cst_10 [0] : vector<16x128xf32> to vector<128xf32>
      %21 = vector.shape_cast %20 : vector<128xf32> to vector<1x128xf32>
      %22 = arith.mulf %14, %14 : vector<16x128xf32>
      %cst_11 = arith.constant dense<0.000000e+00> : vector<128xf32>
      %23 = vector.multi_reduction <add>, %22, %cst_11 [0] : vector<16x128xf32> to vector<128xf32>
      %24 = vector.shape_cast %23 : vector<128xf32> to vector<1x128xf32>
      %25 = tpu.concatenate %21, %24 in 0 : vector<1x128xf32>, vector<1x128xf32> -> vector<2x128xf32>
      %c0_12 = arith.constant 0 : index
      %c0_13 = arith.constant 0 : index
      %26 = vector.load %arg7[%c0_12, %c0_13] : memref<8x128xf32, #tpu.memory_space<vmem>>, vector<2x128xf32>
      %27 = arith.addf %26, %25 : vector<2x128xf32>
      %c0_14 = arith.constant 0 : index
      %c0_15 = arith.constant 0 : index
      %28 = vector.load %arg7[%c0_14, %c0_15] : memref<8x128xf32, #tpu.memory_space<vmem>>, vector<2x128xf32>
      tpu.vector_store %arg7[%c0_14, %c0_15], %27 {strides = array<i32>} : memref<8x128xf32, #tpu.memory_space<vmem>>, vector<2x128xf32>,
      %c0_i32_16 = arith.constant 0 : i32
      %29 = arith.cmpi eq, %arg1, %c0_i32_16 : i32
      %30 = arith.extui %29 : i1 to i32
      %c0_i32_17 = arith.constant 0 : i32
      %31 = arith.cmpi ne, %30, %c0_i32_17 : i32
      scf.if %31 {
        %c0_18 = arith.constant 0 : index
        %c0_19 = arith.constant 0 : index
        %32 = vector.load %arg7[%c0_18, %c0_19] : memref<8x128xf32, #tpu.memory_space<vmem>>, vector<1x128xf32>
        %cst_20 = arith.constant 1.250000e-01 : f32
        %33 = vector.broadcast %cst_20 : f32 to vector<1x128xf32>
        %34 = arith.mulf %32, %33 : vector<1x128xf32>
        %c1 = arith.constant 1 : index
        %c0_21 = arith.constant 0 : index
        %35 = vector.load %arg7[%c1, %c0_21] : memref<8x128xf32, #tpu.memory_space<vmem>>, vector<1x128xf32>
        %cst_22 = arith.constant 1.250000e-01 : f32
        %36 = vector.broadcast %cst_22 : f32 to vector<1x128xf32>
        %37 = arith.mulf %35, %36 : vector<1x128xf32>
        %38 = arith.mulf %34, %34 : vector<1x128xf32>
        %39 = arith.subf %37, %38 : vector<1x128xf32>
        %cst_23 = arith.constant 0.000000e+00 : f32
        %40 = vector.broadcast %cst_23 : f32 to vector<1x128xf32>
        %41 = arith.maximumf %39, %40 : vector<1x128xf32>
        %c0_24 = arith.constant 0 : index
        %c0_25 = arith.constant 0 : index
        %42 = vector.load %arg5[%c0_24, %c0_25] : memref<8x128xf32, #tpu.memory_space<vmem>>, vector<1x128xf32>
        %cst_26 = arith.constant 9.99999974E-6 : f32
        %43 = vector.broadcast %cst_26 : f32 to vector<1x128xf32>
        %44 = arith.addf %41, %43 : vector<1x128xf32>
        %45 = math.rsqrt %44 : vector<1x128xf32>
        %46 = arith.mulf %42, %45 : vector<1x128xf32>
        %c1_27 = arith.constant 1 : index
        %c0_28 = arith.constant 0 : index
        %47 = vector.load %arg5[%c1_27, %c0_28] : memref<8x128xf32, #tpu.memory_space<vmem>>, vector<1x128xf32>
        %48 = arith.mulf %34, %46 : vector<1x128xf32>
        %49 = arith.subf %47, %48 : vector<1x128xf32>
        %50 = tpu.concatenate %46, %49 in 0 : vector<1x128xf32>, vector<1x128xf32> -> vector<2x128xf32>
        %c0_29 = arith.constant 0 : index
        %c0_30 = arith.constant 0 : index
        %51 = vector.load %arg8[%c0_29, %c0_30] : memref<8x128xf32, #tpu.memory_space<vmem>>, vector<2x128xf32>
        tpu.vector_store %arg8[%c0_29, %c0_30], %50 {strides = array<i32>} : memref<8x128xf32, #tpu.memory_space<vmem>>, vector<2x128xf32>,
      } else {
      }
    } else {
    }
    %c1_i32 = arith.constant 1 : i32
    %3 = arith.cmpi eq, %arg0, %c1_i32 : i32
    %4 = arith.extui %3 : i1 to i32
    %c0_i32_1 = arith.constant 0 : i32
    %5 = arith.cmpi ne, %4, %c0_i32_1 : i32
    scf.if %5 {
      %9 = arith.index_cast %arg1 : i32 to index
      %c0 = arith.constant 0 : index
      %c0_3 = arith.constant 0 : index
      %10 = vector.load %arg9[%9, %c0, %c0_3] : memref<1x16x128xbf16, #tpu.memory_space<vmem>>, vector<1x16x128xbf16>
      %11 = vector.shape_cast %10 : vector<1x16x128xbf16> to vector<16x128xbf16>
      %12 = arith.extf %11 : vector<16x128xbf16> to vector<16x128xf32>
      %c0_4 = arith.constant 0 : index
      %c0_5 = arith.constant 0 : index
      %13 = vector.load %arg8[%c0_4, %c0_5] : memref<8x128xf32, #tpu.memory_space<vmem>>, vector<1x128xf32>
      %14 = vector.broadcast %13 : vector<1x128xf32> to vector<16x128xf32>
      %15 = arith.mulf %12, %14 : vector<16x128xf32>
      %c1 = arith.constant 1 : index
      %c0_6 = arith.constant 0 : index
      %16 = vector.load %arg8[%c1, %c0_6] : memref<8x128xf32, #tpu.memory_space<vmem>>, vector<1x128xf32>
      %17 = vector.broadcast %16 : vector<1x128xf32> to vector<16x128xf32>
      %18 = arith.addf %15, %17 : vector<16x128xf32>
      %cst = arith.constant 0.000000e+00 : f32
      %19 = vector.broadcast %cst : f32 to vector<16x128xf32>
      %20 = arith.maximumf %18, %19 : vector<16x128xf32>
      %21 = arith.truncf %20 : vector<16x128xf32> to vector<16x128xbf16>
      %c0_7 = arith.constant 0 : index
      %c0_8 = arith.constant 0 : index
      %22 = vector.load %arg4[%c0_7, %c0_8] : memref<128x128xbf16, #tpu.memory_space<vmem>>, vector<128x128xbf16>
      %cst_9 = arith.constant dense<0.000000e+00> : vector<16x128xf32>
      %23 = tpu.matmul %21, %22, %cst_9 {dimension_numbers = #tpu.dot_dimension_numbers<[1], [0], [0], [1], [0, 0, 1, 1], [], []>} : vector<16x128xbf16>, vector<128x128xbf16>, vector<16x128xf32> -> vector<16x128xf32>
      %24 = arith.truncf %23 : vector<16x128xf32> to vector<16x128xbf16>
      %25 = arith.index_cast %arg1 : i32 to index
      %c0_10 = arith.constant 0 : index
      %c0_11 = arith.constant 0 : index
      %26 = vector.load %arg10[%25, %c0_10, %c0_11] : memref<1x16x128xbf16, #tpu.memory_space<vmem>>, vector<1x16x128xbf16>
      %27 = vector.shape_cast %26 : vector<1x16x128xbf16> to vector<16x128xbf16>
      %28 = vector.shape_cast %24 : vector<16x128xbf16> to vector<1x16x128xbf16>
      tpu.vector_store %arg10[%25, %c0_10, %c0_11], %28 {strides = array<i32>} : memref<1x16x128xbf16, #tpu.memory_space<vmem>>, vector<1x16x128xbf16>,
      %29 = tpu.iota {dimensions = array<i32: 0>} : vector<16x1xi32>
      %c16_i32 = arith.constant 16 : i32
      %30 = arith.muli %arg1, %c16_i32 : i32
      %31 = vector.broadcast %30 : i32 to vector<16x1xi32>
      %32 = arith.addi %31, %29 : vector<16x1xi32>
      %c8_i32 = arith.constant 8 : i32
      %33 = vector.broadcast %c8_i32 : i32 to vector<16x1xi32>
      %34 = arith.cmpi slt, %32, %33 : vector<16x1xi32>
      %35 = arith.extui %34 : vector<16x1xi1> to vector<16x1xi32>
      %36 = arith.sitofp %35 : vector<16x1xi32> to vector<16x1xf32>
      %37 = vector.broadcast %36 : vector<16x1xf32> to vector<16x128xf32>
      %38 = arith.mulf %23, %37 : vector<16x128xf32>
      %cst_12 = arith.constant dense<0.000000e+00> : vector<128xf32>
      %39 = vector.multi_reduction <add>, %38, %cst_12 [0] : vector<16x128xf32> to vector<128xf32>
      %40 = vector.shape_cast %39 : vector<128xf32> to vector<1x128xf32>
      %41 = arith.mulf %38, %23 : vector<16x128xf32>
      %cst_13 = arith.constant dense<0.000000e+00> : vector<128xf32>
      %42 = vector.multi_reduction <add>, %41, %cst_13 [0] : vector<16x128xf32> to vector<128xf32>
      %43 = vector.shape_cast %42 : vector<128xf32> to vector<1x128xf32>
      %44 = tpu.concatenate %40, %43 in 0 : vector<1x128xf32>, vector<1x128xf32> -> vector<2x128xf32>
      %c2 = arith.constant 2 : index
      %c0_14 = arith.constant 0 : index
      %45 = vector.load %arg7[%c2, %c0_14] : memref<8x128xf32, #tpu.memory_space<vmem>>, vector<2x128xf32>
      %46 = arith.addf %45, %44 : vector<2x128xf32>
      %c2_15 = arith.constant 2 : index
      %c0_16 = arith.constant 0 : index
      %47 = vector.load %arg7[%c2_15, %c0_16] : memref<8x128xf32, #tpu.memory_space<vmem>>, vector<2x128xf32>
      tpu.vector_store %arg7[%c2_15, %c0_16], %46 {strides = array<i32>} : memref<8x128xf32, #tpu.memory_space<vmem>>, vector<2x128xf32>,
      %c0_i32_17 = arith.constant 0 : i32
      %48 = arith.cmpi eq, %arg1, %c0_i32_17 : i32
      %49 = arith.extui %48 : i1 to i32
      %c0_i32_18 = arith.constant 0 : i32
      %50 = arith.cmpi ne, %49, %c0_i32_18 : i32
      scf.if %50 {
        %c2_19 = arith.constant 2 : index
        %c0_20 = arith.constant 0 : index
        %51 = vector.load %arg7[%c2_19, %c0_20] : memref<8x128xf32, #tpu.memory_space<vmem>>, vector<1x128xf32>
        %cst_21 = arith.constant 1.250000e-01 : f32
        %52 = vector.broadcast %cst_21 : f32 to vector<1x128xf32>
        %53 = arith.mulf %51, %52 : vector<1x128xf32>
        %c3 = arith.constant 3 : index
        %c0_22 = arith.constant 0 : index
        %54 = vector.load %arg7[%c3, %c0_22] : memref<8x128xf32, #tpu.memory_space<vmem>>, vector<1x128xf32>
        %cst_23 = arith.constant 1.250000e-01 : f32
        %55 = vector.broadcast %cst_23 : f32 to vector<1x128xf32>
        %56 = arith.mulf %54, %55 : vector<1x128xf32>
        %57 = arith.mulf %53, %53 : vector<1x128xf32>
        %58 = arith.subf %56, %57 : vector<1x128xf32>
        %cst_24 = arith.constant 0.000000e+00 : f32
        %59 = vector.broadcast %cst_24 : f32 to vector<1x128xf32>
        %60 = arith.maximumf %58, %59 : vector<1x128xf32>
        %c2_25 = arith.constant 2 : index
        %c0_26 = arith.constant 0 : index
        %61 = vector.load %arg5[%c2_25, %c0_26] : memref<8x128xf32, #tpu.memory_space<vmem>>, vector<1x128xf32>
        %cst_27 = arith.constant 9.99999974E-6 : f32
        %62 = vector.broadcast %cst_27 : f32 to vector<1x128xf32>
        %63 = arith.addf %60, %62 : vector<1x128xf32>
        %64 = math.rsqrt %63 : vector<1x128xf32>
        %65 = arith.mulf %61, %64 : vector<1x128xf32>
        %c3_28 = arith.constant 3 : index
        %c0_29 = arith.constant 0 : index
        %66 = vector.load %arg5[%c3_28, %c0_29] : memref<8x128xf32, #tpu.memory_space<vmem>>, vector<1x128xf32>
        %67 = arith.mulf %53, %65 : vector<1x128xf32>
        %68 = arith.subf %66, %67 : vector<1x128xf32>
        %69 = tpu.concatenate %65, %68 in 0 : vector<1x128xf32>, vector<1x128xf32> -> vector<2x128xf32>
        %c2_30 = arith.constant 2 : index
        %c0_31 = arith.constant 0 : index
        %70 = vector.load %arg8[%c2_30, %c0_31] : memref<8x128xf32, #tpu.memory_space<vmem>>, vector<2x128xf32>
        tpu.vector_store %arg8[%c2_30, %c0_31], %69 {strides = array<i32>} : memref<8x128xf32, #tpu.memory_space<vmem>>, vector<2x128xf32>,
      } else {
      }
    } else {
    }
    %c2_i32 = arith.constant 2 : i32
    %6 = arith.cmpi eq, %arg0, %c2_i32 : i32
    %7 = arith.extui %6 : i1 to i32
    %c0_i32_2 = arith.constant 0 : i32
    %8 = arith.cmpi ne, %7, %c0_i32_2 : i32
    scf.if %8 {
      %9 = arith.index_cast %arg1 : i32 to index
      %c0 = arith.constant 0 : index
      %c0_3 = arith.constant 0 : index
      %10 = vector.load %arg10[%9, %c0, %c0_3] : memref<1x16x128xbf16, #tpu.memory_space<vmem>>, vector<1x16x128xbf16>
      %11 = vector.shape_cast %10 : vector<1x16x128xbf16> to vector<16x128xbf16>
      %12 = arith.extf %11 : vector<16x128xbf16> to vector<16x128xf32>
      %c2 = arith.constant 2 : index
      %c0_4 = arith.constant 0 : index
      %13 = vector.load %arg8[%c2, %c0_4] : memref<8x128xf32, #tpu.memory_space<vmem>>, vector<1x128xf32>
      %14 = vector.broadcast %13 : vector<1x128xf32> to vector<16x128xf32>
      %15 = arith.mulf %12, %14 : vector<16x128xf32>
      %c3 = arith.constant 3 : index
      %c0_5 = arith.constant 0 : index
      %16 = vector.load %arg8[%c3, %c0_5] : memref<8x128xf32, #tpu.memory_space<vmem>>, vector<1x128xf32>
      %17 = vector.broadcast %16 : vector<1x128xf32> to vector<16x128xf32>
      %18 = arith.addf %15, %17 : vector<16x128xf32>
      %cst = arith.constant 0.000000e+00 : f32
      %19 = vector.broadcast %cst : f32 to vector<16x128xf32>
      %20 = arith.maximumf %18, %19 : vector<16x128xf32>
      %21 = vector.extract_strided_slice %20 {offsets = [0, 0], sizes = [16, 64], strides = [1, 1]} : vector<16x128xf32> to vector<16x64xf32>
      %c0_6 = arith.constant 0 : index
      %c0_7 = arith.constant 0 : index
      %22 = vector.load %arg6[%c0_6, %c0_7] : memref<16x64xf32, #tpu.memory_space<vmem>>, vector<16x64xf32>
      tpu.vector_store %arg6[%c0_6, %c0_7], %21 {strides = array<i32>} : memref<16x64xf32, #tpu.memory_space<vmem>>, vector<16x64xf32>,
    } else {
    }
    return
  }
  func.func @transform_0(%arg0: i32, %arg1: i32) -> (i32, i32) {
    %c0_i32 = arith.constant 0 : i32
    %0 = arith.cmpi eq, %arg0, %c0_i32 : i32
    %c0_i32_0 = arith.constant 0 : i32
    %1 = arith.select %0, %arg1, %c0_i32_0 : i32
    %c0_i32_1 = arith.constant 0 : i32
    %c0_i32_2 = arith.constant 0 : i32
    return %1, %c0_i32_1 : i32, i32
  }
  func.func @transform_1(%arg0: i32, %arg1: i32) -> (i32, i32) {
    %c0_i32 = arith.constant 0 : i32
    %c0_i32_0 = arith.constant 0 : i32
    %c0_i32_1 = arith.constant 0 : i32
    return %c0_i32, %c0_i32_0 : i32, i32
  }
  func.func @transform_2(%arg0: i32, %arg1: i32) -> (i32, i32) {
    %c0_i32 = arith.constant 0 : i32
    %c0_i32_0 = arith.constant 0 : i32
    %c0_i32_1 = arith.constant 0 : i32
    return %c0_i32, %c0_i32_0 : i32, i32
  }
  func.func @transform_3(%arg0: i32, %arg1: i32) -> (i32, i32) {
    %c0_i32 = arith.constant 0 : i32
    %c0_i32_0 = arith.constant 0 : i32
    %c0_i32_1 = arith.constant 0 : i32
    return %c0_i32, %c0_i32_0 : i32, i32
  }
  func.func @transform_4(%arg0: i32, %arg1: i32) -> (i32, i32) {
    %c2_i32 = arith.constant 2 : i32
    %0 = arith.cmpi eq, %arg0, %c2_i32 : i32
    %c0_i32 = arith.constant 0 : i32
    %1 = arith.select %0, %arg1, %c0_i32 : i32
    %c0_i32_0 = arith.constant 0 : i32
    %c0_i32_1 = arith.constant 0 : i32
    return %1, %c0_i32_0 : i32, i32
  }
}

</mosaic_0001>

<bundles_post_ra>
// kernel: tpu_custom_call.1
= control target key start
LH: loop header
LB: loop body
LE: loop exit
PB: predicated region body
PF: predicated region fallthrough
CT: control target
= control target key end

     0   :  { %9 = vsyncpa [#allocation7], 0  ;;  %s1581_s0 = inlined_call_operand.hbm [shape: bf16[16,384], index: 0, kind: input, shape index: {}]   ;;  %s1582_s1 = inlined_call_operand.hbm [shape: bf16[384,128], index: 1, kind: input, shape index: {}]   ;;  %s1583_s2 = inlined_call_operand.hbm [shape: bf16[128,128], index: 2, kind: input, shape index: {}]   ;;  %s1584_s3 = inlined_call_operand.hbm [shape: f32[8,128], index: 3, kind: input, shape index: {}]   ;;  %s1585_s4 = inlined_call_operand.hbm [shape: f32[16,64], index: 4, kind: output, shape index: {}]  }
   0x1   :  { %11 = vsyncpa [#allocation7 + $0x1], 0 }
   0x2   :  { %12 = vsyncpa [#allocation10], 0 }
   0x3   :  { %13 = vsyncpa [#allocation13], 0 }
   0x4   :  { %14 = vsyncpa [#allocation8], 0 }
   0x5   :  { %16 = vsyncpa [#allocation8 + $0x1], 0  ;;  %s1483_s15 = smov 0   ;;  %s1485_s16 = smov 0  }
   0x6   :  { %s1487_s17 = smov 0  }
   0x7 LB: > { %s951_s18 = sadd.s32 4294967295, %s1444_s17   ;;  %s952_s19 = sadd.s32 4294967294, %s1444_s17   ;;  %s1444_s17 = sphi %s1487_s17, %s22_s17   ;;  %s1440_s16 = sphi %s1485_s16, %s1590_s16   ;;  %s1436_s15 = sphi %s1483_s15, %s1589_s15  }
   0x8   : > { %s34_s20 = sadd.s32 1, %s1440_s16  ;;  %p953_p0 = scmp.ge.s32.totalorder %s1444_s17, 1 }
   0x9   : > { %p36_p1 = scmp.ge.s32.totalorder %s34_s20, 3  ;;  %p162_p2 = scmp.lt.s32.totalorder %s1444_s17, 4 }
   0xa   : > { %p1505_p3 = scmp.eq.s32.totalorder %s951_s18, 0  ;;  %s173_s25 = sshll.u32 %s1582_s1, 4  ;;  %s174_s25 = int_to_ptr.hbm [resolvable:$true] %s173_s25 }
   0xb   : > { %s1592_s20 = smov (%p36_p1, %s34_s20), 0  ;;  %p1511_p4 = pnand %p953_p0, %p162_p2 }
   0xc   : > { %s1446_s26 = smov [#allocation9]   ;;  %s187_s5 = sshll.u32 %s1583_s2, 4  ;;  %s188_s5 = int_to_ptr.hbm [resolvable:$true] %s187_s5 }
   0xd   : > { %p1184_p5 = pneg %p1511_p4  ;;  %s175_s27 = sshll.u32 %s1446_s26, 4  ;;  %s176_s27 = int_to_ptr.vmem [resolvable:$true] %s175_s27 }
   0xe   : > { %s1447_s6 = smov 64   ;;  %s1448_s7 = smov 4  }
   0xf   : > { %p1522_p6 = pnand %p1505_p3, %p1184_p5  ;;  %s1449_s8 = smov [#allocation11]  }
  0x10   : > { %s189_s9 = sshll.u32 %s1449_s8, 4  ;;  %s202_s12 = sshll.u32 %s1584_s3, 4  ;;  %s190_s9 = int_to_ptr.vmem [resolvable:$true] %s189_s9  ;;  %s203_s12 = int_to_ptr.hbm [resolvable:$true] %s202_s12 }
  0x11   : > { %1187 = dma.hbm_to_vmem [thread:$0]  (!%p1522_p6), %s174_s25, 3072, %s176_s27, [#allocation10], %s1447_s6, %s1447_s6, %s1448_s7  }
  0x12   : > { %1190 = dma.hbm_to_vmem [thread:$0]  (!%p1522_p6), %s188_s5, 1024, %s190_s9, [#allocation10], %s1447_s6, %s1447_s6, %s1448_s7  }
  0x13   : > { %p1205_p7 = scmp.lt.s32.totalorder %s1444_s17, 3  ;;  %s1450_s13 = smov [#allocation12]  }
  0x14   : > { %s204_s14 = sshll.u32 %s1450_s13, 4  ;;  %p1206_p8 = scmp.eq.s32.totalorder %s1444_s17, 0  ;;  %s205_s14 = int_to_ptr.vmem [resolvable:$true] %s204_s14 }
  0x15   : > { %s228_s25 = sshll.u32 %s1581_s0, 4  ;;  %s1451_s26 = smov [#allocation6]   ;;  %s229_s25 = int_to_ptr.hbm [resolvable:$true] %s228_s25 }
  0x16   : > { %1193 = dma.hbm_to_vmem [thread:$0]  (!%p1522_p6), %s203_s12, 128, %s205_s14, [#allocation13]  }
  0x17   : > { %s230_s27 = sshll.u32 %s1451_s26, 4  ;;  %p1195_p9 = pnand %p1206_p8, %p1205_p7  ;;  %s231_s27 = int_to_ptr.vmem [resolvable:$true] %s230_s27 }
  0x18   : > { %s1452_s29 = smov 192   ;;  %s1453_s30 = smov 12  }
  0x19   : > { %1197 = dma.hbm_to_vmem [thread:$0]  (!%p1195_p9), %s229_s25, 384, %s231_s27, [#allocation7], %s1452_s29, %s1452_s29, %s1453_s30  }
  0x1a   : > { %242 = sbr.rel (%p1511_p4) target bundleno = 546 (0x222), region = 36 }
  0x1f   : > { %1419 = dma.done.wait (%p1505_p3), [#allocation7], 384  }
  0x20   : > { %1421 = vsyncadd (%p1505_p3), [#allocation7], 4294966912 }
  0x21   : > { %1423 = dma.done.wait (%p1505_p3), [#allocation10], 4096  }
  0x22   : > { %1425 = vsyncadd (%p1505_p3), [#allocation10], 4294963200 }
  0x23   : > { %1427 = dma.done.wait (%p1505_p3), [#allocation13], 128  }
  0x24   : > { %1429 = vsyncadd (%p1505_p3), [#allocation13], 4294967168  ;;  %p964_p10 = scmp.ne.s32.totalorder %s1436_s15, 0 }
  0x26   : > { %298 = sbr.rel (%p964_p10) target bundleno = 284 (0x11c), region = 56 }
  0x2b   : > { %v1121_v0 = vld [vmem:[#allocation9 + $0x38] sm:$0xff]  ;;  %v1120_v3 = vld [vmem:[#allocation9 + $0x30] sm:$0xff]  ;;  %v1119_v6 = vld [vmem:[#allocation9 + $0x28] sm:$0xff]  ;;  %v1454_v33 = vmov 0.0   ;;  %vm581_vm0 = vcmask 1040384  }
  0x2c   : > { %v1129_v1 = vld [vmem:[#allocation9 + $0x78] sm:$0xff]  ;;  %516 = vmatpush.bf16.msra.mxu0 %v1121_v0  ;;  %v1128_v4 = vld [vmem:[#allocation9 + $0x70] sm:$0xff]  ;;  %v1127_v7 = vld [vmem:[#allocation9 + $0x68] sm:$0xff]  ;;  %303 = vst [vmem:[#allocation2] sm:$0xff] %v1454_v33 }
  0x2d   : > { %v1137_v2 = vld [vmem:[#allocation9 + $0xb8] sm:$0xff]  ;;  %530 = vmatpush.bf16.msra.mxu1 %v1129_v1  ;;  %v1136_v5 = vld [vmem:[#allocation9 + $0xb0] sm:$0xff]  ;;  %v1135_v8 = vld [vmem:[#allocation9 + $0xa8] sm:$0xff] }
  0x2e   : > { %544 = vmatpush.bf16.msra.mxu2 %v1137_v2  ;;  %v1118_v9 = vld [vmem:[#allocation9 + $0x20] sm:$0xff]  ;;  %v1117_v12 = vld [vmem:[#allocation9 + $0x18] sm:$0xff]  ;;  %v1116_v15 = vld [vmem:[#allocation9 + $0x10] sm:$0xff] }
  0x2f   : > { %v1126_v10 = vld [vmem:[#allocation9 + $0x60] sm:$0xff]  ;;  %v1125_v13 = vld [vmem:[#allocation9 + $0x58] sm:$0xff]  ;;  %v1124_v16 = vld [vmem:[#allocation9 + $0x50] sm:$0xff] }
  0x30   : > { %517 = vmatpush.bf16.msra.mxu0 %v1120_v3  ;;  %v1134_v11 = vld [vmem:[#allocation9 + $0xa0] sm:$0xff]  ;;  %v1133_v14 = vld [vmem:[#allocation9 + $0x98] sm:$0xff]  ;;  %v1132_v17 = vld [vmem:[#allocation9 + $0x90] sm:$0xff] }
  0x31   : > { %531 = vmatpush.bf16.msra.mxu1 %v1128_v4  ;;  %v1115_v18 = vld [vmem:[#allocation9 + $0x8] sm:$0xff]  ;;  %v1114_v21 = vld [vmem:[#allocation9] sm:$0xff]  ;;  %v967_v23 = vld [vmem:[#allocation6] sm:$0xf] }
  0x32   : > { %545 = vmatpush.bf16.msra.mxu2 %v1136_v5  ;;  %v1123_v19 = vld [vmem:[#allocation9 + $0x48] sm:$0xff]  ;;  %v1122_v22 = vld [vmem:[#allocation9 + $0x40] sm:$0xff]  ;;  %v1112_v24 = vld [vmem:[#allocation6 + $0x8] sm:$0xf0] }
  0x33   : > { %v1131_v20 = vld [vmem:[#allocation9 + $0x88] sm:$0xff]  ;;  %v1111_v25 = vld [vmem:[#allocation6 + $0x4] sm:$0xf]  ;;  %v969_v26 = vld [vmem:[#allocation6 + $0xc] sm:$0xf0]  ;;  %v968_v30 = vor.u32 %v1112_v24, %v967_v23 }
  0x34   : > { %518 = vmatpush.bf16.msra.mxu0 %v1119_v6  ;;  %v1130_v27 = vld [vmem:[#allocation9 + $0x80] sm:$0xff]  ;;  %v975_v28 = vld [vmem:[#allocation6 + $0x8] sm:$0xf]  ;;  %v972_v31 = vor.u32 %v1111_v25, %v969_v26  ;;  %v583_v61 = vld [vmem:[#allocation2] sm:$0x3] }
  0x35   : > { %532 = vmatpush.bf16.msra.mxu1 %v1127_v7  ;;  %v1113_v29 = vld [vmem:[#allocation6 + $0x10] sm:$0xf0] }
  0x36   : > { %546 = vmatpush.bf16.msra.mxu2 %v1135_v8  ;;  %v976_v32 = vor.u32 %v1113_v29, %v975_v28 }
  0x38   : > { %519 = vmatpush.bf16.msra.mxu0 %v1118_v9 }
  0x39   : > { %533 = vmatpush.bf16.msra.mxu1 %v1126_v10 }
  0x3a   : > { %547 = vmatpush.bf16.msra.mxu2 %v1134_v11 }
  0x3c   : > { %520 = vmatpush.bf16.msra.mxu0 %v1117_v12 }
  0x3d   : > { %534 = vmatpush.bf16.msra.mxu1 %v1125_v13  ;;  %v596_v13 = vld [vmem:[#allocation12] sm:$0x1] }
  0x3e   : > { %548 = vmatpush.bf16.msra.mxu2 %v1133_v14 }
  0x40   : > { %521 = vmatpush.bf16.msra.mxu0 %v1116_v15 }
  0x41   : > { %535 = vmatpush.bf16.msra.mxu1 %v1124_v16 }
  0x42   : > { %549 = vmatpush.bf16.msra.mxu2 %v1132_v17  ;;  %v609_v17 = vld [vmem:[#allocation12 + $0x1] sm:$0x1] }
  0x44   : > { %522 = vmatpush.bf16.msra.mxu0 %v1115_v18 }
  0x45   : > { %536 = vmatpush.bf16.msra.mxu1 %v1123_v19 }
  0x46   : > { %550 = vmatpush.bf16.msra.mxu2 %v1131_v20 }
  0x48   : > { %523 = vmatpush.bf16.msra.mxu0 %v1114_v21 }
  0x49   : > { %537 = vmatpush.bf16.msra.mxu1 %v1122_v22 }
  0x4a   : > { %551 = vmatpush.bf16.msra.mxu2 %v1130_v27 }
  0x4b   : > { %524 = vmatmul.bf16.vlgmr.msra.gmra.mxu0 %v968_v30 }
  0x4c   : > { %538 = vmatmul.bf16.vlgmr.msra.gmra.mxu1 %v972_v31 }
  0x4d   : > { %552 = vmatmul.bf16.vlgmr.msra.gmra.mxu2 %v976_v32 }
  0xc8   : > { %v525_v34 = vpop.f32.mrf.mxu0 }
  0xc9   : > { %v539_v35 = vpop.f32.mrf.mxu1 }
  0xca   : > { %v540_v37 = vadd.f32 %v539_v35, %v525_v34 }
  0xd0   : > { %v553_v36 = vpop.f32.mrf.mxu2  ;;  %v527_v38 = vpop.f32.mrf.mxu0 }
  0xd1   : > { %v541_v39 = vpop.f32.mrf.mxu1  ;;  %v554_v40 = vadd.f32 %v553_v36, %v540_v37 }
  0xd2   : > { %v542_v41 = vadd.f32 %v541_v39, %v527_v38 }
  0xd3   : > { %v572_v44 = vmul.f32 %v554_v40, %v554_v40 }
  0xd8   : > { %v555_v42 = vpop.f32.mrf.mxu2 }
  0xd9   : > { %v556_v43 = vadd.f32 %v555_v42, %v542_v41 }
  0xdb   : > { %v1149_v45 = vpack.c.bf16 %v556_v43, %v554_v40  ;;  %v565_v46 = vadd.f32 %v556_v43, %v554_v40  ;;  %v573_v47 = vmul.f32 %v556_v43, %v556_v43 }
  0xdd   : > { %1150 = vst [vmem:[#allocation4] sm:$0xff] %v1149_v45   ;;  %v566_v48 = vrot.slane %v565_v46, 4  ;;  %v574_v49 = vadd.f32 %v573_v47, %v572_v44 }
  0xdf   : > { %v567_v50 = vadd.f32 %v566_v48, %v565_v46  ;;  %v575_v51 = vrot.slane %v574_v49, 4 }
  0xe1   : > { %v568_v52 = vrot.slane %v567_v50, 2  ;;  %v576_v53 = vadd.f32 %v575_v51, %v574_v49 }
  0xe3   : > { %v569_v54 = vadd.f32 %v568_v52, %v567_v50  ;;  %v577_v55 = vrot.slane %v576_v53, 2 }
  0xe5   : > { %v570_v56 = vrot.slane %v569_v54, 1  ;;  %v578_v57 = vadd.f32 %v577_v55, %v576_v53 }
  0xe7   : > { %v579_v58 = vrot.slane %v578_v57, 1  ;;  %v571_v59 = vadd.f32 %v570_v56, %v569_v54 }
  0xe9   : > { %v580_v60 = vadd.f32 %v579_v58, %v578_v57 }
  0xeb   : > { %v582_v62 = vsel %vm581_vm0, %v571_v59, %v580_v60 }
  0xec   : > { %v584_v63 = vadd.f32 %v583_v61, %v582_v62 }
  0xee   : > { %585 = vst [vmem:[#allocation2] sm:$0x3] %v584_v63 }
  0xf5   : > { %v589_v0 = vld [vmem:[#allocation2] sm:$0x1]  ;;  %v591_v1 = vld [vmem:[#allocation2 + $0x1] sm:$0x1] }
  0xf6   : > { %v590_v2 = vmul.f32 0.125, %v589_v0  ;;  %v592_v3 = vmul.f32 0.125, %v591_v1 }
  0xf8   : > { %v593_v4 = vmul.f32 %v590_v2, %v590_v2 }
  0xfa   : > { %v594_v5 = vsub.f32 %v592_v3, %v593_v4 }
  0xfc   : > { %v595_v6 = vmax.f32 %v594_v5, 0.0 }
  0xfe   : > { %v597_v7 = vadd.f32 1e-05, %v595_v6 }
 0x100   : > { %1250 = vrsqrt.f32 %v597_v7  ;;  %vm604_vm2 = vweird.f32 %v597_v7 }
 0x106   : > { %v1251_v8 = vpop.eup %1250 }
 0x107   : > { %v599_v9 = vmul.f32 %v1251_v8, %v597_v7  ;;  %vm605_vm1 = vweird.f32 %v1251_v8 }
 0x108   : > { %vm606_vm3 = vmor %vm604_vm2, %vm605_vm1 }
 0x109   : > { %v600_v10 = vmul.f32 %v1251_v8, %v599_v9 }
 0x10b   : > { %v601_v11 = vmul.f32 0.5, %v600_v10 }
 0x10d   : > { %v602_v12 = vsub.f32 1.5, %v601_v11 }
 0x10f   : > { %v603_v14 = vmul.f32 %v1251_v8, %v602_v12 }
 0x111   : > { %v607_v15 = vsel %vm606_vm3, %v1251_v8, %v603_v14 }
 0x112   : > { %v608_v16 = vmul.f32 %v607_v15, %v596_v13 }
 0x114   : > { %v610_v18 = vmul.f32 %v608_v16, %v590_v2 }
 0x116   : > { %v611_v19 = vsub.f32 %v609_v17, %v610_v18 }
 0x118   : > { %v613_v20 = vrot.slane %v611_v19, 7 }
 0x11a   : > { %v615_v21 = vsel %vm581_vm0, %v608_v16, %v613_v20 }
 0x11b   : > { %616 = vst [vmem:[#allocation3] sm:$0x3] %v615_v21 }
 0x11c PF: > { %p1073_p11 = scmp.ne.s32.totalorder %s1436_s15, 1 }
 0x11e   : > { %620 = sbr.rel (%p1073_p11) target bundleno = 524 (0x20c), region = 68 }
 0x123   : > { %v1145_v22 = vld [vmem:[#allocation11 + $0x38] sm:$0xff]  ;;  %v1144_v23 = vld [vmem:[#allocation11 + $0x30] sm:$0xff]  ;;  %v1143_v24 = vld [vmem:[#allocation11 + $0x28] sm:$0xff]  ;;  %vm754_vm4 = vcmask 1040384  }
 0x124   : > { %703 = vmatpush.bf16.msra.mxu0 %v1145_v22  ;;  %v1142_v25 = vld [vmem:[#allocation11 + $0x20] sm:$0xff]  ;;  %v1252_v29 = vld [vmem:[#allocation3] ss:$0 sm:$0xff]  ;;  %v1253_v33 = vld [vmem:[#allocation3 + $0x1] ss:$0 sm:$0xff] }
 0x125   : > { %v1152_v26 = vld [vmem:[#allocation4] sm:$0xff]   ;;  %v1141_v30 = vld [vmem:[#allocation11 + $0x18] sm:$0xff]  ;;  %v1140_v34 = vld [vmem:[#allocation11 + $0x10] sm:$0xff] }
 0x126   : > { %v1153_v27 = vunpack.c.l.bf16 %v1152_v26  ;;  %v1154_v28 = vunpack.c.h.bf16 %v1152_v26  ;;  %v1139_v37 = vld [vmem:[#allocation11 + $0x8] sm:$0xff]  ;;  %v1138_v40 = vld [vmem:[#allocation11] sm:$0xff]  ;;  %v756_v62 = vld [vmem:[#allocation2 + $0x2] sm:$0x3] }
 0x127   : > { %v770_v14 = vld [vmem:[#allocation12 + $0x2] sm:$0x1]  ;;  %v783_v18 = vld [vmem:[#allocation12 + $0x3] sm:$0x1] }
 0x128   : > { %704 = vmatpush.bf16.msra.mxu0 %v1144_v23  ;;  %v630_v31 = vmul.f32 %v1252_v29, %v1153_v27  ;;  %v631_v32 = vmul.f32 %v1252_v29, %v1154_v28 }
 0x12a   : > { %v634_v35 = vadd.f32 %v1253_v33, %v630_v31  ;;  %v635_v36 = vadd.f32 %v1253_v33, %v631_v32 }
 0x12c   : > { %705 = vmatpush.bf16.msra.mxu0 %v1143_v24  ;;  %v636_v38 = vmax.f32 %v634_v35, 0.0  ;;  %v637_v39 = vmax.f32 %v635_v36, 0.0 }
 0x12e   : > { %v638_v41 = vpack.c.bf16 %v637_v39, %v636_v38 }
 0x130   : > { %706 = vmatpush.bf16.msra.mxu0 %v1142_v25 }
 0x134   : > { %707 = vmatpush.bf16.msra.mxu0 %v1141_v30 }
 0x138   : > { %708 = vmatpush.bf16.msra.mxu0 %v1140_v34 }
 0x13c   : > { %709 = vmatpush.bf16.msra.mxu0 %v1139_v37 }
 0x140   : > { %710 = vmatpush.bf16.msra.mxu0 %v1138_v40 }
 0x143   : > { %711 = vmatmul.bf16.vlgmr.msra.gmra.mxu0 %v638_v41 }
 0x1c0   : > { %v712_v42 = vpop.f32.mrf.mxu0 }
 0x1c1   : > { %v745_v46 = vmul.f32 %v712_v42, %v712_v42 }
 0x1c8   : > { %v714_v43 = vpop.f32.mrf.mxu0 }
 0x1c9   : > { %v1158_v44 = vpack.c.bf16 %v714_v43, %v712_v42  ;;  %v737_v45 = vmul.f32 0.0, %v714_v43 }
 0x1cb   : > { %1159 = vst [vmem:[#allocation5] sm:$0xff] %v1158_v44   ;;  %v738_v47 = vadd.f32 %v737_v45, %v712_v42  ;;  %v746_v48 = vmul.f32 %v737_v45, %v714_v43 }
 0x1cd   : > { %v739_v49 = vrot.slane %v738_v47, 4  ;;  %v747_v50 = vadd.f32 %v746_v48, %v745_v46 }
 0x1cf   : > { %v740_v51 = vadd.f32 %v739_v49, %v738_v47  ;;  %v748_v52 = vrot.slane %v747_v50, 4 }
 0x1d1   : > { %v741_v53 = vrot.slane %v740_v51, 2  ;;  %v749_v54 = vadd.f32 %v748_v52, %v747_v50 }
 0x1d3   : > { %v742_v55 = vadd.f32 %v741_v53, %v740_v51  ;;  %v750_v56 = vrot.slane %v749_v54, 2 }
 0x1d5   : > { %v743_v57 = vrot.slane %v742_v55, 1  ;;  %v751_v58 = vadd.f32 %v750_v56, %v749_v54 }
 0x1d7   : > { %v752_v59 = vrot.slane %v751_v58, 1  ;;  %v744_v60 = vadd.f32 %v743_v57, %v742_v55 }
 0x1d9   : > { %v753_v61 = vadd.f32 %v752_v59, %v751_v58 }
 0x1db   : > { %v755_v63 = vsel %vm754_vm4, %v744_v60, %v753_v61 }
 0x1dc   : > { %v757_v0 = vadd.f32 %v756_v62, %v755_v63 }
 0x1de   : > { %758 = vst [vmem:[#allocation2 + $0x2] sm:$0x3] %v757_v0 }
 0x1e5   : > { %v763_v1 = vld [vmem:[#allocation2 + $0x2] sm:$0x1]  ;;  %v765_v2 = vld [vmem:[#allocation2 + $0x3] sm:$0x1] }
 0x1e6   : > { %v764_v3 = vmul.f32 0.125, %v763_v1  ;;  %v766_v4 = vmul.f32 0.125, %v765_v2 }
 0x1e8   : > { %v767_v5 = vmul.f32 %v764_v3, %v764_v3 }
 0x1ea   : > { %v768_v6 = vsub.f32 %v766_v4, %v767_v5 }
 0x1ec   : > { %v769_v7 = vmax.f32 %v768_v6, 0.0 }
 0x1ee   : > { %v771_v8 = vadd.f32 1e-05, %v769_v7 }
 0x1f0   : > { %1254 = vrsqrt.f32 %v771_v8  ;;  %vm778_vm6 = vweird.f32 %v771_v8 }
 0x1f6   : > { %v1255_v9 = vpop.eup %1254 }
 0x1f7   : > { %v773_v10 = vmul.f32 %v1255_v9, %v771_v8  ;;  %vm779_vm5 = vweird.f32 %v1255_v9 }
 0x1f8   : > { %vm780_vm7 = vmor %vm778_vm6, %vm779_vm5 }
 0x1f9   : > { %v774_v11 = vmul.f32 %v1255_v9, %v773_v10 }
 0x1fb   : > { %v775_v12 = vmul.f32 0.5, %v774_v11 }
 0x1fd   : > { %v776_v13 = vsub.f32 1.5, %v775_v12 }
 0x1ff   : > { %v777_v15 = vmul.f32 %v1255_v9, %v776_v13 }
 0x201   : > { %v781_v16 = vsel %vm780_vm7, %v1255_v9, %v777_v15 }
 0x202   : > { %v782_v17 = vmul.f32 %v781_v16, %v770_v14 }
 0x204   : > { %v784_v19 = vmul.f32 %v782_v17, %v764_v3 }
 0x206   : > { %v785_v20 = vsub.f32 %v783_v18, %v784_v19 }
 0x208   : > { %v787_v21 = vrot.slane %v785_v20, 7 }
 0x20a   : > { %v789_v22 = vsel %vm754_vm4, %v782_v17, %v787_v21 }
 0x20b   : > { %790 = vst [vmem:[#allocation3 + $0x2] sm:$0x3] %v789_v22 }
 0x20c PF: > { %p1106_p12 = scmp.ne.s32.totalorder %s1436_s15, 2 }
 0x20e   : > { %794 = sbr.rel (%p1106_p12) target bundleno = 542 (0x21e), region = 76 }
 0x213   : > { %v1161_v23 = vld [vmem:[#allocation5] sm:$0xff]   ;;  %v1256_v24 = vld [vmem:[#allocation3 + $0x2] ss:$0 sm:$0xff]  ;;  %v1257_v26 = vld [vmem:[#allocation3 + $0x3] ss:$0 sm:$0xff]  ;;  %vm812_vm8 = vcmask 523264  }
 0x214   : > { %v1162_v25 = vunpack.c.l.bf16 %v1161_v23  ;;  %v1163_v27 = vunpack.c.h.bf16 %v1161_v23 }
 0x216   : > { %v804_v28 = vmul.f32 %v1256_v24, %v1162_v25  ;;  %v805_v29 = vmul.f32 %v1256_v24, %v1163_v27 }
 0x218   : > { %v808_v30 = vadd.f32 %v1257_v26, %v804_v28  ;;  %v809_v31 = vadd.f32 %v1257_v26, %v805_v29 }
 0x21a   : > { %v810_v32 = vmax.f32 %v808_v30, 0.0  ;;  %v811_v33 = vmax.f32 %v809_v31, 0.0 }
 0x21c   : > { %813 = vst.msk [vmem:[#allocation14] sm:$0xff] %vm812_vm8, %v810_v32 }
 0x21d   : > { %814 = vst.msk [vmem:[#allocation14 + $0x8] sm:$0xff] %vm812_vm8, %v811_v33 }
 0x21e PF: > { %p1211_p13 = scmp.eq.s32.totalorder %s951_s18, 2  ;;  %s832_s22 = sshll.u32 %s1585_s4, 4  ;;  %s833_s22 = int_to_ptr.hbm [resolvable:$true] %s832_s22 }
 0x21f   : > { %s1455_s28 = smov [#allocation14]   ;;  %s1456_s6 = smov 128  }
 0x220   : > { %s830_s5 = sshll.u32 %s1455_s28, 4  ;;  %s1457_s7 = smov 8   ;;  %s831_s5 = int_to_ptr.vmem [resolvable:$true] %s830_s5 }
 0x221   : > { %1181 = dma.vmem_to_hbm [thread:$0]  (%p1211_p13), %s831_s5, 256, %s833_s22, [#allocation8], %s1456_s6, %s1456_s6, %s1457_s7  }
 0x222 PF: > { %p1212_p0 = scmp.ge.s32.totalorder %s1444_s17, 2  ;;  %p1213_p1 = scmp.eq.s32.totalorder %s952_s19, 2 }
 0x224   : > { %p1199_p2 = pnand %p1213_p1, %p1212_p0 }
 0x226   : > { %p1200_p3 = pneg %p1199_p2 }
 0x228   : > { %1431 = dma.done.wait (%p1200_p3), [#allocation8], 256  }
 0x229   : > { %1433 = vsyncadd (%p1200_p3), [#allocation8], 4294967040  ;;  %s22_s17 = sadd.s32 1, %s1444_s17   ;;  %s1589_s15 = smov %s1440_s16 }
 0x22a   : > { %p19_p4 = scmp.ge.s32.totalorder %s22_s17, 5   ;;  %s1590_s16 = smov %s1592_s20 }
 0x22c   :  { %21 = sbr.rel (!%p19_p4) target bundleno = 7 (0x7), region = 121 }
 0x231   :  { %854 = vsyncpa [#allocation7], 1 }
 0x232   :  { %856 = vsyncpa [#allocation7 + $0x1], 1 }
 0x233   :  { %857 = vsyncpa [#allocation10], 1 }
 0x234   :  { %858 = vsyncpa [#allocation13], 1 }
 0x235   :  { %859 = vsyncpa [#allocation8], 1 }
 0x236   :  { %861 = vsyncpa [#allocation8 + $0x1], 1 }

</bundles_post_ra>
